<compile_context>
chip_gen: v6e
topology: v6e:2x2x1
jax: 0.10.0
libtpu: 0.0.40
codegen_flags: <defaults>
</compile_context>

<pallas_src>
import math

import jax
import jax.numpy as jnp
import numpy as np
from jax.experimental import pallas as pl
from jax.experimental.pallas import tpu as pltpu


def _round_up(x, m):
    return ((x + m - 1) // m) * m


def _choose_row_tile(n_node):
    """Row tile over nodes, sized so the double-buffered bf16 A row blocks
    (2 planes x 2 pipeline buffers) stay under ~24 MiB (fits v7x VMEM)."""
    n8 = _round_up(max(n_node, 1), 8)
    if n8 <= 256:
        return n8
    budget = 24 * 1024 * 1024          # bytes for the 4 in-flight A buffers
    tm = 256
    while tm > 8 and 4 * tm * n8 * 2 > budget:
        tm //= 2
    return tm


def _propagator_kernel(a_ref, s_in_ref, s_cur_ref,
                       w_ain_ref, w_aout_ref, w_sin_ref, w_rcur_ref, b_ref,
                       out_ref):
    tm, d = out_ref.shape                                   # row tile, padded D
    row = pl.multiple_of(pl.program_id(0) * tm, 8)

    s_in_all = s_in_ref[...]                                # (Np, Dp) resident

    # ---- message aggregation on the MXU (f32 accumulation) -----------------
    a_in = jnp.dot(a_ref[0], s_in_all, preferred_element_type=jnp.float32)
    a_out = jnp.dot(a_ref[1], s_in_all, preferred_element_type=jnp.float32)

    s_in_tile = s_in_ref[pl.ds(row, tm), :].astype(jnp.float32)   # (tm, Dp)
    s_cur = s_cur_ref[...].astype(jnp.float32)                    # (tm, Dp)

    # ---- fused gate pre-activations (3 wide matmuls instead of 9 small) ----
    pre = (jnp.dot(a_in, w_ain_ref[...], preferred_element_type=jnp.float32)
           + jnp.dot(a_out, w_aout_ref[...], preferred_element_type=jnp.float32)
           + b_ref[...])                                          # (tm, 3*Dp)

    rz = jax.nn.sigmoid(
        pre[:, :2 * d]
        + jnp.dot(s_in_tile, w_sin_ref[...], preferred_element_type=jnp.float32))
    r = rz[:, :d]                      # reset gate
    z = rz[:, d:]                      # update gate

    h_hat = jnp.tanh(
        pre[:, 2 * d:]
        + jnp.dot(r * s_cur, w_rcur_ref[...], preferred_element_type=jnp.float32))

    out_ref[...] = ((1.0 - z) * s_cur + z * h_hat).astype(out_ref.dtype)


def prepare_propagator_params(params, state_dim):
    """One-time weight prep (call OUTSIDE the per-propagation-step hot loop).

    nn.Linear computes x @ W.T; split W.T (3D, D) into its three D-row blocks
    per gate, fuse them column-wise per input operand, and zero-pad everything
    to a lane-dense Dp (multiple of 128)."""
    D = state_dim
    Dp = _round_up(D, 128)

    def split_cols(W):
        Wt_ = W.T                                  # (3D, D)
        return Wt_[:D], Wt_[D:2 * D], Wt_[2 * D:]

    (Wr, br), (Wz, bz), (Wt, bt) = (params["reset"], params["update"],
                                    params["transform"])
    wr1, wr2, wr3 = split_cols(Wr)
    wz1, wz2, wz3 = split_cols(Wz)
    wt1, wt2, wt3 = split_cols(Wt)

    def pad2(x):
        return jnp.pad(x, ((0, Dp - x.shape[0]), (0, Dp - x.shape[1])))

    def pad1(b):
        return jnp.pad(b, (0, Dp - b.shape[0]))

    return {
        "w_ain": jnp.concatenate([pad2(wr1), pad2(wz1), pad2(wt1)], axis=1),  # (Dp, 3Dp)
        "w_aout": jnp.concatenate([pad2(wr2), pad2(wz2), pad2(wt2)], axis=1),  # (Dp, 3Dp)
        "w_sin": jnp.concatenate([pad2(wr3), pad2(wz3)], axis=1),              # (Dp, 2Dp)
        "w_rcur": pad2(wt3),                                                   # (Dp, Dp)
        "bias": jnp.concatenate([pad1(br), pad1(bz), pad1(bt)]).reshape(1, 3 * Dp),
        "state_dim": D,
        "d_pad": Dp,
    }


def propagator_forward(state_in, state_out, state_cur, A, prepared,
                       *, use_bf16_inputs=True, row_block=None):
    """Pallas equivalent of Propogator.forward.

    state_in / state_out / state_cur : (n_node, state_dim) float32
    A                                : (n_node, n_node, 2) float32 (PyTorch layout)
    prepared                         : output of prepare_propagator_params
    """
    del state_out  # unused by the reference forward, kept for API parity
    N, D = state_in.shape
    Dp = prepared["d_pad"]
    assert prepared["state_dim"] == D

    # Plane-major adjacency: each plane becomes a contiguous rectangular DMA.
    # TODO(synk): have the caller store A as (2, n_node, n_node) to skip this transpose.
    A_planes = jnp.transpose(A, (2, 0, 1))

    tm = row_block if row_block is not None else _choose_row_tile(N)
    Np = _round_up(N, tm)

    mm_dtype = jnp.bfloat16 if use_bf16_inputs else state_in.dtype
    a_itemsize = 2 if use_bf16_inputs else 4

    A_p = jnp.pad(A_planes, ((0, 0), (0, Np - N), (0, Np - N))).astype(mm_dtype)
    s_in_p = jnp.pad(state_in, ((0, Np - N), (0, Dp - D))).astype(mm_dtype)
    s_cur_p = jnp.pad(state_cur, ((0, Np - N), (0, Dp - D)))   # f32 elementwise path

    resident = lambda i: (0, 0)   # full-array VMEM residents (no per-step re-DMA)

    cost = pl.CostEstimate(
        flops=int(2 * (2 * Np * Np * Dp) + 2 * Np * 9 * Dp * Dp),
        transcendentals=int(3 * Np * Dp),
        bytes_accessed=int(2 * Np * Np * a_itemsize + Np * Dp * a_itemsize
                           + 2 * Np * Dp * 4 + 9 * Dp * Dp * 4 + 3 * Dp * 4),
    )

    out = pl.pallas_call(
        _propagator_kernel,
        out_shape=jax.ShapeDtypeStruct((Np, Dp), state_cur.dtype),
        grid=(Np // tm,),
        in_specs=[
            pl.BlockSpec((2, tm, Np), lambda i: (0, i, 0)),   # A row blocks (streamed)
            pl.BlockSpec((Np, Dp), resident),                 # state_in (resident)
            pl.BlockSpec((tm, Dp), lambda i: (i, 0)),         # state_cur tile
            pl.BlockSpec((Dp, 3 * Dp), resident),             # fused weights
            pl.BlockSpec((Dp, 3 * Dp), resident),
            pl.BlockSpec((Dp, 2 * Dp), resident),
            pl.BlockSpec((Dp, Dp), resident),
            pl.BlockSpec((1, 3 * Dp), resident),              # fused bias
        ],
        out_specs=pl.BlockSpec((tm, Dp), lambda i: (i, 0)),
        compiler_params=pltpu.CompilerParams(
            dimension_semantics=("parallel",),     # megacore sharding on v7x
            vmem_limit_bytes=48 * 1024 * 1024,     # explicit; fits v7x 64 MiB physical
        ),
        cost_estimate=cost,
    )(A_p, s_in_p, s_cur_p,
      prepared["w_ain"], prepared["w_aout"], prepared["w_sin"],
      prepared["w_rcur"], prepared["bias"])

    return out[:N, :D]


def init_params(key, state_dim):
    """Deterministic nn.Linear(state_dim*3, state_dim)-style init."""
    D = state_dim
    bound = 1.0 / math.sqrt(3 * D)
    params = {}
    for name in ("reset", "update", "transform"):
        key, kw, kb = jax.random.split(key, 3)
        W = jax.random.uniform(kw, (D, 3 * D), jnp.float32, -bound, bound)
        b = jax.random.uniform(kb, (D,), jnp.float32, -bound, bound)
        params[name] = (W, b)
    return params


def propagator_reference(state_in, state_cur, A, params):
    """Pure-JAX reference matching the PyTorch forward exactly."""
    A_in = A[:, :, 0]
    A_out = A[:, :, 1]
    a_in = A_in @ state_in
    a_out = A_out @ state_in
    a = jnp.concatenate((a_in, a_out, state_in), axis=1)
    (Wr, br), (Wz, bz), (Wt, bt) = (params["reset"], params["update"],
                                    params["transform"])
    r = jax.nn.sigmoid(a @ Wr.T + br)
    z = jax.nn.sigmoid(a @ Wz.T + bz)
    joined = jnp.concatenate((a_in, a_out, r * state_cur), axis=1)
    h_hat = jnp.tanh(joined @ Wt.T + bt)
    return (1.0 - z) * state_cur + z * h_hat


if __name__ == "__main__":
    state_dim = 32
    n_node = 24

    key = jax.random.PRNGKey(0)
    k1, k2, k3, k4, kp = jax.random.split(key, 5)
    state_in = jax.random.normal(k1, (n_node, state_dim), jnp.float32)
    state_out = jax.random.normal(k2, (n_node, state_dim), jnp.float32)
    state_cur = jax.random.normal(k3, (n_node, state_dim), jnp.float32)
    A = jax.random.normal(k4, (n_node, n_node, 2), jnp.float32)

    params = init_params(kp, state_dim)
    prepared = prepare_propagator_params(params, state_dim)

    # 1) full-precision path with a multi-tile grid (row_block=8 -> 3 row tiles)
    out_f32 = propagator_forward(state_in, state_out, state_cur, A, prepared,
                                 use_bf16_inputs=False, row_block=8)
    out_f32 = jax.block_until_ready(out_f32)
    ref_f32 = propagator_reference(state_in, state_cur, A, params)
    np.testing.assert_allclose(np.asarray(out_f32), np.asarray(ref_f32),
                               rtol=1e-4, atol=1e-4)

    # 2) default bf16-fed MXU path: compare against a reference that sees the
    #    same bf16-rounded A / state_in (f32 accumulation everywhere).
    out_bf16 = propagator_forward(state_in, state_out, state_cur, A, prepared,
                                  use_bf16_inputs=True)
    out_bf16 = jax.block_until_ready(out_bf16)
    A_q = A.astype(jnp.bfloat16).astype(jnp.float32)
    s_in_q = state_in.astype(jnp.bfloat16).astype(jnp.float32)
    ref_bf16 = propagator_reference(s_in_q, state_cur, A_q, params)
    np.testing.assert_allclose(np.asarray(out_bf16), np.asarray(ref_bf16),
                               rtol=5e-3, atol=5e-3)

    print("KERNEL_OK")
</pallas_src>

<mosaic_0001>
module attributes {stable_mosaic.version = 11 : i64} {
  func.func @_propagator_kernel(%arg0: i32, %arg1: memref<2x8x24xf32, #tpu.memory_space<vmem>>, %arg2: memref<24x128xf32, #tpu.memory_space<vmem>>, %arg3: memref<8x128xf32, #tpu.memory_space<vmem>>, %arg4: memref<128x384xf32, #tpu.memory_space<vmem>>, %arg5: memref<128x384xf32, #tpu.memory_space<vmem>>, %arg6: memref<128x256xf32, #tpu.memory_space<vmem>>, %arg7: memref<128x128xf32, #tpu.memory_space<vmem>>, %arg8: memref<1x384xf32, #tpu.memory_space<vmem>>, %arg9: memref<8x128xf32, #tpu.memory_space<vmem>>) attributes {dimension_semantics = [#tpu.dimension_semantics<parallel>], iteration_bounds = array<i64: 3>, scalar_prefetch = 0 : i64, scratch_operands = 0 : i64, tpu.core_type = #tpu.core_type<tc>, window_params = [{transform_indices = @transform_0, window_bounds = array<i64: 2, 8, 24>}, {pipeline_mode = #tpu.pipeline_mode<synchronous>, transform_indices = @transform_1, window_bounds = array<i64: 24, 128>}, {transform_indices = @transform_2, window_bounds = array<i64: 8, 128>}, {pipeline_mode = #tpu.pipeline_mode<synchronous>, transform_indices = @transform_3, window_bounds = array<i64: 128, 384>}, {pipeline_mode = #tpu.pipeline_mode<synchronous>, transform_indices = @transform_4, window_bounds = array<i64: 128, 384>}, {pipeline_mode = #tpu.pipeline_mode<synchronous>, transform_indices = @transform_5, window_bounds = array<i64: 128, 256>}, {pipeline_mode = #tpu.pipeline_mode<synchronous>, transform_indices = @transform_6, window_bounds = array<i64: 128, 128>}, {pipeline_mode = #tpu.pipeline_mode<synchronous>, transform_indices = @transform_7, window_bounds = array<i64: 1, 384>}, {transform_indices = @transform_8, window_bounds = array<i64: 8, 128>}]} {
    %c8_i32 = arith.constant 8 : i32
    %0 = arith.muli %arg0, %c8_i32 : i32
    %1 = tpu.assume_multiple %0, 8 : i32
    %c0 = arith.constant 0 : index
    %c0_0 = arith.constant 0 : index
    %2 = vector.load %arg2[%c0, %c0_0] : memref<24x128xf32, #tpu.memory_space<vmem>>, vector<24x128xf32>
    %c0_1 = arith.constant 0 : index
    %c0_2 = arith.constant 0 : index
    %c0_3 = arith.constant 0 : index
    %3 = vector.load %arg1[%c0_1, %c0_2, %c0_3] : memref<2x8x24xf32, #tpu.memory_space<vmem>>, vector<1x8x24xf32>
    %4 = vector.shape_cast %3 : vector<1x8x24xf32> to vector<8x24xf32>
    %cst = arith.constant dense<0.000000e+00> : vector<8x128xf32>
    %5 = tpu.matmul %4, %2, %cst {dimension_numbers = #tpu.dot_dimension_numbers<[1], [0], [0], [1], [0, 0, 1, 1], [], []>} : vector<8x24xf32>, vector<24x128xf32>, vector<8x128xf32> -> vector<8x128xf32>
    %c1 = arith.constant 1 : index
    %c0_4 = arith.constant 0 : index
    %c0_5 = arith.constant 0 : index
    %6 = vector.load %arg1[%c1, %c0_4, %c0_5] : memref<2x8x24xf32, #tpu.memory_space<vmem>>, vector<1x8x24xf32>
    %7 = vector.shape_cast %6 : vector<1x8x24xf32> to vector<8x24xf32>
    %cst_6 = arith.constant dense<0.000000e+00> : vector<8x128xf32>
    %8 = tpu.matmul %7, %2, %cst_6 {dimension_numbers = #tpu.dot_dimension_numbers<[1], [0], [0], [1], [0, 0, 1, 1], [], []>} : vector<8x24xf32>, vector<24x128xf32>, vector<8x128xf32> -> vector<8x128xf32>
    %9 = arith.index_cast %1 : i32 to index
    %c0_7 = arith.constant 0 : index
    %10 = vector.load %arg2[%9, %c0_7] : memref<24x128xf32, #tpu.memory_space<vmem>>, vector<8x128xf32>
    %c0_8 = arith.constant 0 : index
    %c0_9 = arith.constant 0 : index
    %11 = vector.load %arg3[%c0_8, %c0_9] : memref<8x128xf32, #tpu.memory_space<vmem>>, vector<8x128xf32>
    %c0_10 = arith.constant 0 : index
    %c0_11 = arith.constant 0 : index
    %12 = vector.load %arg4[%c0_10, %c0_11] : memref<128x384xf32, #tpu.memory_space<vmem>>, vector<128x384xf32>
    %cst_12 = arith.constant dense<0.000000e+00> : vector<8x384xf32>
    %13 = tpu.matmul %5, %12, %cst_12 {dimension_numbers = #tpu.dot_dimension_numbers<[1], [0], [0], [1], [0, 0, 1, 1], [], []>} : vector<8x128xf32>, vector<128x384xf32>, vector<8x384xf32> -> vector<8x384xf32>
    %c0_13 = arith.constant 0 : index
    %c0_14 = arith.constant 0 : index
    %14 = vector.load %arg5[%c0_13, %c0_14] : memref<128x384xf32, #tpu.memory_space<vmem>>, vector<128x384xf32>
    %cst_15 = arith.constant dense<0.000000e+00> : vector<8x384xf32>
    %15 = tpu.matmul %8, %14, %cst_15 {dimension_numbers = #tpu.dot_dimension_numbers<[1], [0], [0], [1], [0, 0, 1, 1], [], []>} : vector<8x128xf32>, vector<128x384xf32>, vector<8x384xf32> -> vector<8x384xf32>
    %16 = arith.addf %13, %15 : vector<8x384xf32>
    %c0_16 = arith.constant 0 : index
    %c0_17 = arith.constant 0 : index
    %17 = vector.load %arg8[%c0_16, %c0_17] : memref<1x384xf32, #tpu.memory_space<vmem>>, vector<1x384xf32>
    %18 = vector.broadcast %17 : vector<1x384xf32> to vector<8x384xf32>
    %19 = arith.addf %16, %18 : vector<8x384xf32>
    %20 = vector.extract_strided_slice %19 {offsets = [0, 0], sizes = [8, 256], strides = [1, 1]} : vector<8x384xf32> to vector<8x256xf32>
    %c0_18 = arith.constant 0 : index
    %c0_19 = arith.constant 0 : index
    %21 = vector.load %arg6[%c0_18, %c0_19] : memref<128x256xf32, #tpu.memory_space<vmem>>, vector<128x256xf32>
    %cst_20 = arith.constant dense<0.000000e+00> : vector<8x256xf32>
    %22 = tpu.matmul %10, %21, %cst_20 {dimension_numbers = #tpu.dot_dimension_numbers<[1], [0], [0], [1], [0, 0, 1, 1], [], []>} : vector<8x128xf32>, vector<128x256xf32>, vector<8x256xf32> -> vector<8x256xf32>
    %23 = arith.addf %20, %22 : vector<8x256xf32>
    %24 = arith.negf %23 : vector<8x256xf32>
    %25 = math.exp %24 : vector<8x256xf32>
    %cst_21 = arith.constant 1.000000e+00 : f32
    %26 = vector.broadcast %cst_21 : f32 to vector<8x256xf32>
    %27 = arith.addf %26, %25 : vector<8x256xf32>
    %28 = arith.divf %26, %27 : vector<8x256xf32>
    %29 = vector.extract_strided_slice %28 {offsets = [0, 0], sizes = [8, 128], strides = [1, 1]} : vector<8x256xf32> to vector<8x128xf32>
    %30 = vector.extract_strided_slice %28 {offsets = [0, 128], sizes = [8, 128], strides = [1, 1]} : vector<8x256xf32> to vector<8x128xf32>
    %31 = vector.extract_strided_slice %19 {offsets = [0, 256], sizes = [8, 128], strides = [1, 1]} : vector<8x384xf32> to vector<8x128xf32>
    %32 = arith.mulf %29, %11 : vector<8x128xf32>
    %c0_22 = arith.constant 0 : index
    %c0_23 = arith.constant 0 : index
    %33 = vector.load %arg7[%c0_22, %c0_23] : memref<128x128xf32, #tpu.memory_space<vmem>>, vector<128x128xf32>
    %cst_24 = arith.constant dense<0.000000e+00> : vector<8x128xf32>
    %34 = tpu.matmul %32, %33, %cst_24 {dimension_numbers = #tpu.dot_dimension_numbers<[1], [0], [0], [1], [0, 0, 1, 1], [], []>} : vector<8x128xf32>, vector<128x128xf32>, vector<8x128xf32> -> vector<8x128xf32>
    %35 = arith.addf %31, %34 : vector<8x128xf32>
    %36 = math.tanh %35 : vector<8x128xf32>
    %cst_25 = arith.constant 1.000000e+00 : f32
    %37 = vector.broadcast %cst_25 : f32 to vector<8x128xf32>
    %38 = arith.subf %37, %30 : vector<8x128xf32>
    %39 = arith.mulf %38, %11 : vector<8x128xf32>
    %40 = arith.mulf %30, %36 : vector<8x128xf32>
    %41 = arith.addf %39, %40 : vector<8x128xf32>
    %c0_26 = arith.constant 0 : index
    %c0_27 = arith.constant 0 : index
    %42 = vector.load %arg9[%c0_26, %c0_27] : memref<8x128xf32, #tpu.memory_space<vmem>>, vector<8x128xf32>
    tpu.vector_store %arg9[%c0_26, %c0_27], %41 {strides = array<i32>} : memref<8x128xf32, #tpu.memory_space<vmem>>, vector<8x128xf32>,
    return
  }
  func.func @transform_0(%arg0: i32) -> (i32, i32, i32) {
    %c0_i32 = arith.constant 0 : i32
    %c0_i32_0 = arith.constant 0 : i32
    %c0_i32_1 = arith.constant 0 : i32
    return %c0_i32, %arg0, %c0_i32_0 : i32, i32, i32
  }
  func.func @transform_1(%arg0: i32) -> (i32, i32) {
    %c0_i32 = arith.constant 0 : i32
    %c0_i32_0 = arith.constant 0 : i32
    %c0_i32_1 = arith.constant 0 : i32
    return %c0_i32, %c0_i32_0 : i32, i32
  }
  func.func @transform_2(%arg0: i32) -> (i32, i32) {
    %c0_i32 = arith.constant 0 : i32
    %c0_i32_0 = arith.constant 0 : i32
    return %arg0, %c0_i32 : i32, i32
  }
  func.func @transform_3(%arg0: i32) -> (i32, i32) {
    %c0_i32 = arith.constant 0 : i32
    %c0_i32_0 = arith.constant 0 : i32
    %c0_i32_1 = arith.constant 0 : i32
    return %c0_i32, %c0_i32_0 : i32, i32
  }
  func.func @transform_4(%arg0: i32) -> (i32, i32) {
    %c0_i32 = arith.constant 0 : i32
    %c0_i32_0 = arith.constant 0 : i32
    %c0_i32_1 = arith.constant 0 : i32
    return %c0_i32, %c0_i32_0 : i32, i32
  }
  func.func @transform_5(%arg0: i32) -> (i32, i32) {
    %c0_i32 = arith.constant 0 : i32
    %c0_i32_0 = arith.constant 0 : i32
    %c0_i32_1 = arith.constant 0 : i32
    return %c0_i32, %c0_i32_0 : i32, i32
  }
  func.func @transform_6(%arg0: i32) -> (i32, i32) {
    %c0_i32 = arith.constant 0 : i32
    %c0_i32_0 = arith.constant 0 : i32
    %c0_i32_1 = arith.constant 0 : i32
    return %c0_i32, %c0_i32_0 : i32, i32
  }
  func.func @transform_7(%arg0: i32) -> (i32, i32) {
    %c0_i32 = arith.constant 0 : i32
    %c0_i32_0 = arith.constant 0 : i32
    %c0_i32_1 = arith.constant 0 : i32
    return %c0_i32, %c0_i32_0 : i32, i32
  }
  func.func @transform_8(%arg0: i32) -> (i32, i32) {
    %c0_i32 = arith.constant 0 : i32
    %c0_i32_0 = arith.constant 0 : i32
    return %arg0, %c0_i32 : i32, i32
  }
}

</mosaic_0001>

<bundles_post_ra>
// kernel: tpu_custom_call.1
= control target key start
LH: loop header
LB: loop body
LE: loop exit
PB: predicated region body
PF: predicated region fallthrough
CT: control target
= control target key end

     0   :  { %s2381_s0 = inlined_call_operand.hbm [shape: f32[2,24,24], index: 0, kind: input, shape index: {}]   ;;  %s2382_s1 = inlined_call_operand.hbm [shape: f32[24,128], index: 1, kind: input, shape index: {}]   ;;  %s2383_s2 = inlined_call_operand.hbm [shape: f32[24,128], index: 2, kind: input, shape index: {}]   ;;  %s2384_s3 = inlined_call_operand.hbm [shape: f32[128,384], index: 3, kind: input, shape index: {}]   ;;  %s2385_s4 = inlined_call_operand.hbm [shape: f32[128,384], index: 4, kind: input, shape index: {}]   ;;  %s2386_s5 = inlined_call_operand.hbm [shape: f32[128,256], index: 5, kind: input, shape index: {}]   ;;  %s2387_s6 = inlined_call_operand.hbm [shape: f32[128,128], index: 6, kind: input, shape index: {}]   ;;  %s2388_s7 = inlined_call_operand.vmem [shape: f32[1,384], index: 7, kind: input, shape index: {}]   ;;  %s2389_s8 = inlined_call_operand.hbm [shape: f32[24,128], index: 8, kind: output, shape index: {}]  }
   0x1   :  { %2410 = sst [smem:[#allocation26_spill]] %s2381_s0 }
   0x2   :  { %2411 = sst [smem:[#allocation27_spill]] %s2382_s1 }
   0x3   :  { %2412 = sst [smem:[#allocation28_spill]] %s2384_s3 }
   0x4   :  { %2413 = sst [smem:[#allocation29_spill]] %s2385_s4 }
   0x5   :  { %2414 = sst [smem:[#allocation30_spill]] %s2389_s8 }
   0x6   :  { %13 = vsyncpa [#allocation3], 0 }
   0x7   :  { %15 = vsyncpa [#allocation3 + $0x1], 0 }
   0x8   :  { %16 = vsyncpa [#allocation6], 0 }
   0x9   :  { %17 = vsyncpa [#allocation10], 0 }
   0xa   :  { %18 = vsyncpa [#allocation13], 0 }
   0xb   :  { %19 = vsyncpa [#allocation4], 0 }
   0xc   :  { %21 = vsyncpa [#allocation4 + $0x1], 0  ;;  %s2016_s27 = smov 0   ;;  %s2018_s28 = smov 0  }
   0xd   :  { %s2020_s29 = smov 0   ;;  %s2022_s30 = smov 0  }
   0xe LB: > { %2415 = sst [smem:[#allocation22_spill]] %s1941_s27  ;;  %s2037_s9 = sadd.s32 4294967295, %s1953_s30   ;;  %s1953_s30 = sphi %s2022_s30, %s2452_s30   ;;  %s1949_s29 = sphi %s2020_s29, %s2456_s29   ;;  %s1945_s28 = sphi %s2018_s28, %s2455_s28   ;;  %s1941_s27 = sphi %s2016_s27, %s2454_s27  }
   0xf   : > { %s1350_s10 = sadd.s32 4294967294, %s1953_s30   ;;  %p47_p0 = scmp.ne.s32.totalorder %s1945_s28, %s1941_s27 }
  0x10   : > { %p2401_p1 = scmp.eq.s32.totalorder %s2037_s9, 0  ;;  %p223_p2 = scmp.eq.s32.totalorder %s2037_s9, 2 }
  0x11   : > { %p229_p3 = scmp.eq.s32.totalorder %s1350_s10, 2  ;;  %p1351_p5 = scmp.ge.s32.totalorder %s1953_s30, 1 }
  0x12   : > { %p2046_p4 = por %p2401_p1, %p47_p0  ;;  %p236_p7 = scmp.lt.s32.totalorder %s1953_s30, 4 }
  0x13   : > { %p2051_p6 = por %p229_p3, %p47_p0  ;;  %s1955_s14 = smov [#allocation5]  }
  0x14   : > { %s2416_s11 = scalar_select %p2046_p4, 1, 0 }
  0x15   : > { %s2417_s12 = scalar_select %p2051_p6, 1, 0 }
  0x16   : > { %p2056_p8 = pnand %p1351_p5, %p236_p7  ;;  %s248_s15 = sshll.u32 %s1955_s14, 4  ;;  %s249_s15 = int_to_ptr.vmem [resolvable:$true] %s248_s15 }
  0x17   : > { %2418 = sst [smem:[#allocation23_spill]] %s2417_s12  ;;  %s1956_s17 = smov [#allocation9]  }
  0x18   : > { %s2419_s13 = scalar_select %p2056_p8, 1, 0 }
  0x19   : > { %p1589_p9 = pneg %p2056_p8  ;;  %s274_s18 = sshll.u32 %s1956_s17, 4  ;;  %s275_s18 = int_to_ptr.vmem [resolvable:$true] %s274_s18 }
  0x1a   : > { %s1694_s20 = scalar_lea.vmem %s249_s15, 384  ;;  %p1702_p3 = scmp.lt.s32.totalorder %s249_s15, %s249_s15 }
  0x1b   : > { %p2064_p10 = pnand %p1589_p9, %p2401_p1  ;;  %p1695_p12 = scmp.ne.s32.totalorder %s249_s15, %s1694_s20 }
  0x1c   : > { %p1703_p5 = scmp.lt.s32.totalorder %s1694_s20, %s1694_s20 }
  0x1d   : > { %s2420_s16 = scalar_select %p2064_p10, 1, 0 }
  0x1e   : > { %p2070_p11 = pneg %p2064_p10  ;;  %p1704_p7 = por %p1703_p5, %p1702_p3 }
  0x20   : > { %p1697_p13 = pnand %p1695_p12, %p2070_p11 }
  0x22   : > { %p1698_p0 = pneg %p1697_p13 }
  0x24   : > { %p1705_p9 = pnand %p1704_p7, %p1698_p0 }
  0x26   : > { %1708 = shalt.err (!%p1705_p9)
}
  0x27   : > { %s2393_s21 = smov 128   ;;  %s2395_s22 = smov 8  }
  0x28   : > { %s2422_s1 = sld [smem:[#allocation27_spill]]  ;;  %s1720_s25 = scalar_lea.vmem %s275_s18, 6144 }
  0x29   : > { %p1721_p12 = scmp.ne.s32.totalorder %s275_s18, %s1720_s25  ;;  %p1728_p0 = scmp.lt.s32.totalorder %s275_s18, %s275_s18 }
  0x2a   : > { %p1729_p5 = scmp.lt.s32.totalorder %s1720_s25, %s1720_s25 }
  0x2b   : > { %p1723_p13 = pnand %p1721_p12, %p2070_p11 }
  0x2c   : > { %p1730_p7 = por %p1729_p5, %p1728_p0 }
  0x2d   : > { %p1724_p3 = pneg %p1723_p13 }
  0x2e   : > { %1592 = dma.hbm_to_vmem [thread:$0]  (!%p2064_p10), %s2422_s1, 384, %s249_s15, [#allocation6], %s2393_s21, %s2393_s21, %s2395_s22  }
  0x2f   : > { %p1731_p9 = pnand %p1730_p7, %p1724_p3 }
  0x31   : > { %1734 = shalt.err (!%p1731_p9)
}
  0x32   : > { %s2391_s26 = smov 384   ;;  %s2390_s10 = smov 24  }
  0x33   : > { %s2423_s4 = sld [smem:[#allocation29_spill]]  ;;  %s2095_s17 = sadd.s32 1, %s1953_s30  }
  0x34   : > { %2424 = sst [smem:[#allocation24_spill]] %s2095_s17  ;;  %s34_s20 = sadd.s32 1, %s1949_s29 }
  0x35   : > { %s31_s23 = ssub.s32 %s1953_s30, %s2095_s17  ;;  %p41_p12 = scmp.ne.s32.totalorder %s1949_s29, %s1945_s28 }
  0x36   : > { %p32_p13 = scmp.eq.s32.totalorder %s31_s23, 0  ;;  %p42_p3 = scmp.eq.s32.totalorder %s1953_s30, 0 }
  0x37   : > { %p2105_p0 = por %p223_p2, %p41_p12  ;;  %p1621_p5 = scmp.lt.s32.totalorder %s1953_s30, 3 }
  0x38   : > { %s2111_s25 = scalar_select %p32_p13, %s1949_s29, %s34_s20  }
  0x39   : > { %1598 = dma.hbm_to_vmem [thread:$0]  (!%p2064_p10), %s2423_s4, 6144, %s275_s18, [#allocation10], %s2391_s26, %s2391_s26, %s2390_s10  }
  0x3a   : > { %s2425_s24 = scalar_select %p2105_p0, 1, 0 }
  0x3b   : > { %2426 = sst [smem:[#allocation25_spill]] %s2111_s25  ;;  %p43_p7 = por %p42_p3, %p41_p12 }
  0x3c   : > { %s317_s14 = sand.u32 1, %s1953_s30   ;;  %s2397_s15 = sand.u32 1, %s1949_s29  }
  0x3d   : > { %s1358_s18 = sshll.u32 %s2397_s15, 4  ;;  %s2398_s10 = sshll.u32 %s1953_s30, 7 }
  0x3e   : > { %s2427_s0 = sld [smem:[#allocation26_spill]]  ;;  %s321_s22 = scalar_lea.vmem [#allocation2], %s1358_s18 }
  0x3f   : > { %s327_s1 = sshll.u32 %s321_s22, 4  ;;  %p2125_p2 = pnand %p1621_p5, %p43_p7  ;;  %s2129_s1 = int_to_ptr.vmem [resolvable:$true] %s327_s1 }
  0x40   : > { %s1961_s15 = smov [#allocation8]   ;;  %s2133_s25 = scalar_lea.sflag [#allocation3], %s317_s14 }
  0x41   : > { %s2131_s4 = sshll.u32 %s1961_s15, 4  ;;  %p1737_p12 = pneg %p2125_p2  ;;  %s262_s4 = int_to_ptr.vmem [resolvable:$true] %s2131_s4 }
  0x44   : > { %s2123_s23 = scalar_lea.hbm %s2427_s0, %s2398_s10  ;;  %s1740_s18 = scalar_lea.hbm %s2427_s0, 768 }
  0x45   : > { %s1735_s21 = scalar_lea.hbm %s2123_s23, 256  ;;  %p1741_p5 = scmp.lt.s32.totalorder %s2123_s23, %s2427_s0 }
  0x46   : > { %p1736_p9 = scmp.ne.s32.totalorder %s2123_s23, %s1735_s21  ;;  %p1742_p7 = scmp.lt.s32.totalorder %s1740_s18, %s1735_s21 }
  0x48   : > { %p1738_p13 = pnand %p1737_p12, %p1736_p9  ;;  %p1743_p1 = por %p1742_p7, %p1741_p5 }
  0x4a   : > { %p1739_p3 = pneg %p1738_p13 }
  0x4c   : > { %p1744_p6 = pnand %p1743_p1, %p1739_p3 }
  0x4e   : > { %1747 = shalt.err (!%p1744_p6)
}
  0x4f   : > { %s1748_s14 = scalar_lea.vmem %s2129_s1, 256  ;;  %s1962_s15 = smov [#allocation2]  }
  0x50   : > { %p1749_p0 = scmp.ne.s32.totalorder %s2129_s1, %s1748_s14  ;;  %s1753_s22 = sshll.u32 %s1962_s15, 4  ;;  %s1754_s22 = int_to_ptr.vmem [resolvable:$false] %s1753_s22 }
  0x51   : > { %s1755_s26 = scalar_lea.vmem %s1754_s22, 512  ;;  %p1756_p4 = scmp.lt.s32.totalorder %s2129_s1, %s1754_s22 }
  0x52   : > { %p1751_p9 = pnand %p1749_p0, %p1737_p12  ;;  %p1757_p8 = scmp.lt.s32.totalorder %s1755_s26, %s1748_s14 }
  0x54   : > { %p1752_p13 = pneg %p1751_p9  ;;  %p1758_p10 = por %p1757_p8, %p1756_p4 }
  0x56   : > { %p1759_p5 = pnand %p1758_p10, %p1752_p13 }
  0x58   : > { %1762 = shalt.err (!%p1759_p5)
}
  0x59   : > { %s2429_s10 = smov 8   ;;  %s2430_s17 = smov 128  }
  0x5a   : > { %s2431_s21 = smov 384   ;;  %s1774_s18 = scalar_lea.vmem %s262_s4, 6144 }
  0x5b   : > { %1608 = dma.hbm_to_vmem [thread:$0]  (!%p2125_p2), %s2123_s23, 256, %s2129_s1, %s2133_s25, %s2431_s21, %s2430_s17, %s2429_s10  }
  0x5c   : > { %p1775_p1 = scmp.ne.s32.totalorder %s262_s4, %s1774_s18  ;;  %p1782_p4 = scmp.lt.s32.totalorder %s262_s4, %s262_s4 }
  0x5d   : > { %p1783_p8 = scmp.lt.s32.totalorder %s1774_s18, %s1774_s18 }
  0x5e   : > { %p1777_p6 = pnand %p1775_p1, %p2070_p11 }
  0x5f   : > { %p1784_p10 = por %p1783_p8, %p1782_p4 }
  0x60   : > { %p1778_p0 = pneg %p1777_p6 }
  0x62   : > { %p1785_p3 = pnand %p1784_p10, %p1778_p0 }
  0x64   : > { %1788 = shalt.err (!%p1785_p3)
}
  0x65   : > { %p2432_p7 = scmp.ne.s32.totalorder %s2420_s16, 0  ;;  %s2433_s14 = smov 24  }
  0x66   : > { %s2434_s3 = sld [smem:[#allocation28_spill]]  ;;  %s1963_s1 = smov [#allocation11]  }
  0x67   : > { %s287_s23 = sshll.u32 %s1963_s1, 4  ;;  %s288_s23 = int_to_ptr.vmem [resolvable:$true] %s287_s23 }
  0x68   : > { %s1800_s26 = scalar_lea.vmem %s288_s23, 4096  ;;  %p1808_p1 = scmp.lt.s32.totalorder %s288_s23, %s288_s23 }
  0x69   : > { %p1801_p9 = scmp.ne.s32.totalorder %s288_s23, %s1800_s26  ;;  %p1809_p6 = scmp.lt.s32.totalorder %s1800_s26, %s1800_s26 }
  0x6b   : > { %p1803_p13 = pnand %p1801_p9, %p2070_p11  ;;  %p1810_p0 = por %p1809_p6, %p1808_p1 }
  0x6c   : > { %1595 = dma.hbm_to_vmem [thread:$0]  (!%p2432_p7), %s2434_s3, 6144, %s262_s4, [#allocation6], %s2431_s21, %s2431_s21, %s2433_s14  }
  0x6d   : > { %p1804_p5 = pneg %p1803_p13 }
  0x6f   : > { %p1811_p4 = pnand %p1810_p0, %p1804_p5 }
  0x71   : > { %1814 = shalt.err (!%p1811_p4)
}
  0x72   : > { %s1964_s18 = smov 256   ;;  %s1965_s15 = smov 16  }
  0x73   : > { %1601 = dma.hbm_to_vmem [thread:$0]  (!%p2432_p7), %s2386_s5, 4096, %s288_s23, [#allocation10], %s1964_s18, %s1964_s18, %s1965_s15  }
  0x74   : > { %s2435_s14 = sand.u32 1, %s1949_s29   ;;  %s1966_s1 = smov [#allocation12]  }
  0x75   : > { %s1360_s22 = sshll.u32 %s2435_s14, 3  ;;  %s300_s0 = sshll.u32 %s1966_s1, 4  ;;  %s301_s0 = int_to_ptr.vmem [resolvable:$true] %s300_s0 }
  0x76   : > { %s2436_s26 = sshll.u32 %s1953_s30, 7  ;;  %s1826_s8 = scalar_lea.vmem %s301_s0, 2048 }
  0x77   : > { %s2188_s27 = scalar_lea.hbm %s2383_s2, %s2436_s26  ;;  %p1827_p8 = scmp.ne.s32.totalorder %s301_s0, %s1826_s8 }
  0x78   : > { %p1834_p9 = scmp.lt.s32.totalorder %s301_s0, %s301_s0  ;;  %p1835_p13 = scmp.lt.s32.totalorder %s1826_s8, %s1826_s8 }
  0x79   : > { %p1829_p10 = pnand %p1827_p8, %p2070_p11 }
  0x7a   : > { %p1836_p5 = por %p1835_p13, %p1834_p9 }
  0x7b   : > { %p1830_p3 = pneg %p1829_p10 }
  0x7d   : > { %p1837_p1 = pnand %p1836_p5, %p1830_p3 }
  0x7f   : > { %1840 = shalt.err (!%p1837_p1)
}
  0x80   : > { %1604 = dma.hbm_to_vmem [thread:$0]  (!%p2432_p7), %s2387_s6, 2048, %s301_s0, [#allocation13], %s2430_s17, %s2430_s17, %s2429_s10  }
  0x81   : > { %s341_s3 = scalar_lea.vmem [#allocation7], %s1360_s22  ;;  %s1841_s8 = scalar_lea.hbm %s2188_s27, 128 }
  0x82   : > { %s348_s12 = sshll.u32 %s341_s3, 4  ;;  %p1842_p11 = scmp.ne.s32.totalorder %s2188_s27, %s1841_s8  ;;  %s349_s12 = int_to_ptr.vmem [resolvable:$true] %s348_s12 }
  0x83   : > { %s1846_s15 = scalar_lea.hbm %s2383_s2, 384  ;;  %p1847_p4 = scmp.lt.s32.totalorder %s2188_s27, %s2383_s2 }
  0x84   : > { %p1844_p6 = pnand %p1842_p11, %p1737_p12  ;;  %p1848_p8 = scmp.lt.s32.totalorder %s1846_s15, %s1841_s8 }
  0x86   : > { %p1845_p0 = pneg %p1844_p6  ;;  %p1849_p10 = por %p1848_p8, %p1847_p4 }
  0x88   : > { %p1850_p7 = pnand %p1849_p10, %p1845_p0 }
  0x8a   : > { %1853 = shalt.err (!%p1850_p7)
}
  0x8b   : > { %s1854_s0 = scalar_lea.vmem %s349_s12, 128  ;;  %s1967_s10 = smov [#allocation7]  }
  0x8c   : > { %p1855_p3 = scmp.ne.s32.totalorder %s349_s12, %s1854_s0  ;;  %s1859_s17 = sshll.u32 %s1967_s10, 4  ;;  %s1860_s17 = int_to_ptr.vmem [resolvable:$false] %s1859_s17 }
  0x8d   : > { %s1861_s14 = scalar_lea.vmem %s1860_s17, 256  ;;  %p1862_p5 = scmp.lt.s32.totalorder %s349_s12, %s1860_s17 }
  0x8e   : > { %p1857_p9 = pnand %p1855_p3, %p1737_p12  ;;  %p1863_p1 = scmp.lt.s32.totalorder %s1861_s14, %s1854_s0 }
  0x90   : > { %p1858_p13 = pneg %p1857_p9  ;;  %p1864_p11 = por %p1863_p1, %p1862_p5 }
  0x92   : > { %p1865_p6 = pnand %p1864_p11, %p1858_p13 }
  0x94   : > { %1868 = shalt.err (!%p1865_p6)
}
  0x95   : > { %1611 = dma.hbm_to_vmem [thread:$0]  (!%p2125_p2), %s2188_s27, 128, %s349_s12, %s2133_s25  }
  0x96   : > { %p2437_p0 = scmp.ne.s32.totalorder %s2419_s13, 0 }
  0x97   : > { %s359_s22 = sand.u32 (!%p2437_p0), 1, %s2037_s9   ;;  %s2223_s1 = sand.u32 (!%p2437_p0), 1, %s1945_s28  }
  0x98   : > { %357 = sbr.rel (%p2437_p0) target bundleno = 895 (0x37f), region = 52  ;;  %s1363_s26 = sshll.u32 (!%p2437_p0), %s2223_s1, 4 }
  0x99   : > { %s360_s23 = scalar_lea.sflag (!%p2437_p0), [#allocation3], %s359_s22  ;;  %s2226_s18 = scalar_lea.vmem (!%p2437_p0), [#allocation2], %s1363_s26 }
  0x9a   : > { %p2438_p12 = scmp.ne.s32.totalorder (!%p2437_p0), %s2416_s11, 0 }
  0x9d   : > { %1912 = dma.done.wait (%p2438_p12), %s360_s23, 256  }
  0x9e   : > { %1914 = vsyncadd (%p2438_p12), %s360_s23, 4294967040  ;;  %p2439_p2 = scmp.eq.s32.totalorder %s2037_s9, 0 }
  0xa0   : > { %1916 = dma.done.wait (%p2439_p2), [#allocation6], 384   ;;  %p2440_p4 = pmov %p2439_p2 }
  0xa1   : > { %s1365_s27 = sshll.u32 %s2223_s1, 3 }
  0xa2   : > { %1918 = vsyncadd (%p2440_p4), [#allocation6], 4294966912  ;;  %s2239_s13 = scalar_lea.vmem [#allocation7], %s1365_s27 }
  0xa3   : > { %1920 = dma.done.wait (%p2438_p12), %s360_s23, 128  }
  0xa4   : > { %1922 = vsyncadd (%p2438_p12), %s360_s23, 4294967168  ;;  %p2441_p8 = pmov %p2439_p2 }
  0xa5   : > { %p2442_p10 = pmov %p2439_p2 }
  0xa6   : > { %1924 = dma.done.wait (%p2441_p8), [#allocation6], 6144  }
  0xa7   : > { %1926 = vsyncadd (%p2442_p10), [#allocation6], 4294961152  ;;  %p2443_p7 = pmov %p2439_p2 }
  0xa8   : > { %p2444_p3 = pmov %p2439_p2 }
  0xa9   : > { %1928 = dma.done.wait (%p2443_p7), [#allocation10], 10240  }
  0xaa   : > { %1930 = vsyncadd (%p2444_p3), [#allocation10], 4294957056  ;;  %p2445_p9 = pmov %p2439_p2 }
  0xab   : > { %p2446_p13 = pmov %p2439_p2 }
  0xac   : > { %1932 = dma.done.wait (%p2445_p9), [#allocation13], 2048  }
  0xad   : > { %1934 = vsyncadd (%p2446_p13), [#allocation13], 4294965248  ;;  %v1968_v0 = vmov 0.0   ;;  %vm1969_vm0 = vmmov 0   ;;  %v433_v1 = vld [vmem:[#allocation5 + $0x10] sm:$0xff]  ;;  %v432_v2 = vld [vmem:[#allocation5 + $0x8] sm:$0xff] }
  0xae   : > { %1449 = vmatprep.subr.mxu1 %v1968_v0  ;;  %1455 = vmatprep.mubr.msk.f32.mxu1 %vm1969_vm0, %v1968_v0  ;;  %v431_v3 = vld [vmem:[#allocation5] sm:$0xff]  ;;  %vm435_vm1 = vcmask 195584   ;;  %v1373_v4 = vld [vmem:[%s2226_s18 + $0x8] sm:$0xff]  ;;  %v680_v7 = vld [vmem:[#allocation9 + $0x168] sm:$0xff]  ;;  %s1371_s11 = sshll.u32 %s2037_s9, 3  ;;  %s1378_s12 = sshll.u32 %s2037_s9, 7 }
  0xaf   : > { %1440 = vmatprep.subr.mxu0 %v1968_v0  ;;  %1446 = vmatprep.mubr.msk.f32.mxu0 %vm1969_vm0, %v1968_v0  ;;  %v434_v5 = vld [vmem:[%s2226_s18] sm:$0xff]  ;;  %v681_v6 = vld [vmem:[#allocation9 + $0x170] sm:$0xff]  ;;  %v679_v11 = vld [vmem:[#allocation9 + $0x160] sm:$0xff]  ;;  %s584_s25 = scalar_lea.vmem [#allocation5], %s1371_s11  ;;  %s429_s8 = scalar_lea.vmem [#allocation14], %s1365_s27 }
  0xb0   : > { %1450 = vmatpush3.msra.mxu1 %v433_v1  ;;  %1441 = vmatpush3.msra.mxu0 %v433_v1  ;;  %v682_v8 = vld [vmem:[#allocation9 + $0x178] sm:$0xff]  ;;  %v677_v10 = vld [vmem:[#allocation9 + $0x150] sm:$0xff]  ;;  %v675_v12 = vld [vmem:[#allocation9 + $0x140] sm:$0xff]  ;;  %s1210_s16 = sshll.u32 %s429_s8, 4  ;;  %s2447_s4 = sld [smem:[#allocation30_spill]]  ;;  %s1211_s16 = int_to_ptr.vmem [resolvable:$true] %s1210_s16 }
  0xb1   : > { %1451 = vmatprep.subr.mxu1 %v1968_v0  ;;  %1442 = vmatprep.subr.mxu0 %v1968_v0  ;;  %v678_v9 = vld [vmem:[#allocation9 + $0x158] sm:$0xff]  ;;  %v676_v14 = vld [vmem:[#allocation9 + $0x148] sm:$0xff]  ;;  %v671_v16 = vld [vmem:[#allocation9 + $0x120] sm:$0xff]  ;;  %s1197_s0 = scalar_lea.sflag [#allocation4], %s2223_s1  ;;  %s1869_s10 = scalar_lea.vmem %s1211_s16, 128 }
  0xb2   : > { %1452 = vmatpush3.msra.mxu1 %v432_v2  ;;  %1443 = vmatpush3.msra.mxu0 %v432_v2  ;;  %v674_v13 = vld [vmem:[#allocation9 + $0x138] sm:$0xff]  ;;  %v672_v15 = vld [vmem:[#allocation9 + $0x128] sm:$0xff]  ;;  %v673_v17 = vld [vmem:[#allocation9 + $0x130] sm:$0xff]  ;;  %p1870_p5 = scmp.ne.s32.totalorder %s1211_s16, %s1869_s10  ;;  %p2448_p1 = scmp.ne.s32.totalorder %s2425_s24, 0 }
  0xb3   : > { %1453 = vmatprep.subr.mxu1 %v1968_v0  ;;  %1444 = vmatprep.subr.mxu0 %v1968_v0  ;;  %v669_v18 = vld [vmem:[#allocation9 + $0x110] sm:$0xff]  ;;  %v668_v19 = vld [vmem:[#allocation9 + $0x108] sm:$0xff]  ;;  %v670_v20 = vld [vmem:[#allocation9 + $0x118] sm:$0xff]  ;;  %s1970_s17 = smov [#allocation14]  }
  0xb4   : > { %1454 = vmatpush3.msra.mxu1 %v431_v3  ;;  %1445 = vmatpush3.msra.mxu0 %v431_v3  ;;  %v666_v21 = vld [vmem:[#allocation9 + $0xf8] sm:$0xff]  ;;  %v665_v22 = vld [vmem:[#allocation9 + $0xf0] sm:$0xff]  ;;  %v667_v23 = vld [vmem:[#allocation9 + $0x100] sm:$0xff]  ;;  %p1871_p11 = pnand %p1870_p5, %p2448_p1  ;;  %s1873_s14 = sshll.u32 %s1970_s17, 4  ;;  %s1874_s14 = int_to_ptr.vmem [resolvable:$false] %s1873_s14 }
  0xb5   : > { %1456 = vmatmul.mubr.msk.f32.vlgmr.msra.gmra.mxu1 %vm435_vm1, %v1373_v4  ;;  %1447 = vmatmul.mubr.msk.f32.vlgmr.msra.gmra.mxu0 %vm435_vm1, %v434_v5  ;;  %v663_v24 = vld [vmem:[#allocation9 + $0xe0] sm:$0xff]  ;;  %v662_v25 = vld [vmem:[#allocation9 + $0xd8] sm:$0xff]  ;;  %v664_v26 = vld [vmem:[#allocation9 + $0xe8] sm:$0xff]  ;;  %s1875_s9 = scalar_lea.vmem %s1874_s14, 256  ;;  %p1876_p0 = scmp.lt.s32.totalorder %s1211_s16, %s1874_s14 }
  0xb6   : > { %683 = vmatprep.subr.mxu0 %v681_v6  ;;  %1458 = vmatprep.subr.mxu1 %v1968_v0  ;;  %v660_v27 = vld [vmem:[#allocation9 + $0xc8] sm:$0xff]  ;;  %v659_v28 = vld [vmem:[#allocation9 + $0xc0] sm:$0xff]  ;;  %v661_v29 = vld [vmem:[#allocation9 + $0xd0] sm:$0xff]  ;;  %s1208_s21 = scalar_lea.hbm %s2447_s4, %s1378_s12  ;;  %p1872_p6 = pneg %p1871_p11 }
  0xb7   : > { %684 = vmatpush1.msra.mxu0 %v680_v7  ;;  %1459 = vmatpush3.msra.mxu1 %v682_v8  ;;  %v657_v30 = vld [vmem:[#allocation9 + $0xb0] sm:$0xff]  ;;  %v656_v31 = vld [vmem:[#allocation9 + $0xa8] sm:$0xff]  ;;  %v658_v32 = vld [vmem:[#allocation9 + $0xb8] sm:$0xff]  ;;  %p1877_p12 = scmp.lt.s32.totalorder %s1875_s9, %s1869_s10 }
  0xb8   : > { %685 = vmatprep.subr.mxu0 %v678_v9  ;;  %1460 = vmatprep.subr.mxu1 %v1968_v0  ;;  %v654_v33 = vld [vmem:[#allocation9 + $0x98] sm:$0xff]  ;;  %v653_v34 = vld [vmem:[#allocation9 + $0x90] sm:$0xff]  ;;  %v655_v35 = vld [vmem:[#allocation9 + $0xa0] sm:$0xff] }
  0xb9   : > { %686 = vmatpush1.msra.mxu0 %v677_v10  ;;  %1461 = vmatpush3.msra.mxu1 %v679_v11  ;;  %v651_v36 = vld [vmem:[#allocation9 + $0x80] sm:$0xff]  ;;  %v650_v37 = vld [vmem:[#allocation9 + $0x78] sm:$0xff]  ;;  %v652_v38 = vld [vmem:[#allocation9 + $0x88] sm:$0xff]  ;;  %p1878_p2 = por %p1877_p12, %p1876_p0 }
  0xba   : > { %687 = vmatprep.subr.mxu0 %v675_v12  ;;  %1462 = vmatprep.subr.mxu1 %v1968_v0  ;;  %v648_v39 = vld [vmem:[#allocation9 + $0x68] sm:$0xff]  ;;  %v647_v40 = vld [vmem:[#allocation9 + $0x60] sm:$0xff]  ;;  %v649_v41 = vld [vmem:[#allocation9 + $0x70] sm:$0xff] }
  0xbb   : > { %688 = vmatpush1.msra.mxu0 %v674_v13  ;;  %1463 = vmatpush3.msra.mxu1 %v676_v14  ;;  %v645_v42 = vld [vmem:[#allocation9 + $0x50] sm:$0xff]  ;;  %v644_v43 = vld [vmem:[#allocation9 + $0x48] sm:$0xff]  ;;  %v646_v44 = vld [vmem:[#allocation9 + $0x58] sm:$0xff]  ;;  %p1879_p4 = pnand %p1878_p2, %p1872_p6 }
  0xbc   : > { %689 = vmatprep.subr.mxu0 %v672_v15  ;;  %1464 = vmatprep.subr.mxu1 %v1968_v0  ;;  %v642_v45 = vld [vmem:[#allocation9 + $0x38] sm:$0xff]  ;;  %v641_v46 = vld [vmem:[#allocation9 + $0x30] sm:$0xff]  ;;  %v643_v47 = vld [vmem:[#allocation9 + $0x40] sm:$0xff] }
  0xbd   : > { %690 = vmatpush1.msra.mxu0 %v671_v16  ;;  %1465 = vmatpush3.msra.mxu1 %v673_v17  ;;  %v639_v48 = vld [vmem:[#allocation9 + $0x20] sm:$0xff]  ;;  %v638_v49 = vld [vmem:[#allocation9 + $0x18] sm:$0xff]  ;;  %v640_v50 = vld [vmem:[#allocation9 + $0x28] sm:$0xff] }
  0xbe   : > { %691 = vmatprep.subr.mxu0 %v669_v18  ;;  %1466 = vmatprep.subr.mxu1 %v1968_v0  ;;  %v636_v51 = vld [vmem:[#allocation9 + $0x8] sm:$0xff]  ;;  %v635_v52 = vld [vmem:[#allocation9] sm:$0xff]  ;;  %v637_v53 = vld [vmem:[#allocation9 + $0x10] sm:$0xff] }
  0xbf   : > { %692 = vmatpush1.msra.mxu0 %v668_v19  ;;  %1467 = vmatpush3.msra.mxu1 %v670_v20  ;;  %v633_v54 = vld [vmem:[#allocation8 + $0x170] sm:$0xff]  ;;  %v632_v55 = vld [vmem:[#allocation8 + $0x168] sm:$0xff]  ;;  %v634_v56 = vld [vmem:[#allocation8 + $0x178] sm:$0xff] }
  0xc0   : > { %693 = vmatprep.subr.mxu0 %v666_v21  ;;  %1468 = vmatprep.subr.mxu1 %v1968_v0  ;;  %v630_v58 = vld [vmem:[#allocation8 + $0x158] sm:$0xff]  ;;  %v629_v60 = vld [vmem:[#allocation8 + $0x150] sm:$0xff]  ;;  %v631_v61 = vld [vmem:[#allocation8 + $0x160] sm:$0xff] }
  0xc1   : > { %694 = vmatpush1.msra.mxu0 %v665_v22  ;;  %1469 = vmatpush3.msra.mxu1 %v667_v23  ;;  %v627_v63 = vld [vmem:[#allocation8 + $0x140] sm:$0xff]  ;;  %v626_v2 = vld [vmem:[#allocation8 + $0x138] sm:$0xff]  ;;  %v628_v3 = vld [vmem:[#allocation8 + $0x148] sm:$0xff] }
  0xc2   : > { %695 = vmatprep.subr.mxu0 %v663_v24  ;;  %1470 = vmatprep.subr.mxu1 %v1968_v0  ;;  %v624_v4 = vld [vmem:[#allocation8 + $0x128] sm:$0xff]  ;;  %v623_v5 = vld [vmem:[#allocation8 + $0x120] sm:$0xff]  ;;  %v625_v6 = vld [vmem:[#allocation8 + $0x130] sm:$0xff] }
  0xc3   : > { %696 = vmatpush1.msra.mxu0 %v662_v25  ;;  %1471 = vmatpush3.msra.mxu1 %v664_v26  ;;  %v621_v7 = vld [vmem:[#allocation8 + $0x110] sm:$0xff]  ;;  %v620_v8 = vld [vmem:[#allocation8 + $0x108] sm:$0xff]  ;;  %v622_v9 = vld [vmem:[#allocation8 + $0x118] sm:$0xff] }
  0xc4   : > { %697 = vmatprep.subr.mxu0 %v660_v27  ;;  %1472 = vmatprep.subr.mxu1 %v1968_v0  ;;  %v618_v10 = vld [vmem:[#allocation8 + $0xf8] sm:$0xff]  ;;  %v617_v11 = vld [vmem:[#allocation8 + $0xf0] sm:$0xff]  ;;  %v619_v12 = vld [vmem:[#allocation8 + $0x100] sm:$0xff] }
  0xc5   : > { %698 = vmatpush1.msra.mxu0 %v659_v28  ;;  %1473 = vmatpush3.msra.mxu1 %v661_v29  ;;  %v615_v13 = vld [vmem:[#allocation8 + $0xe0] sm:$0xff]  ;;  %v614_v14 = vld [vmem:[#allocation8 + $0xd8] sm:$0xff]  ;;  %v616_v15 = vld [vmem:[#allocation8 + $0xe8] sm:$0xff] }
  0xc6   : > { %699 = vmatprep.subr.mxu0 %v657_v30  ;;  %1474 = vmatprep.subr.mxu1 %v1968_v0  ;;  %v612_v16 = vld [vmem:[#allocation8 + $0xc8] sm:$0xff]  ;;  %v611_v17 = vld [vmem:[#allocation8 + $0xc0] sm:$0xff]  ;;  %v613_v18 = vld [vmem:[#allocation8 + $0xd0] sm:$0xff] }
  0xc7   : > { %700 = vmatpush1.msra.mxu0 %v656_v31  ;;  %1475 = vmatpush3.msra.mxu1 %v658_v32  ;;  %v609_v19 = vld [vmem:[#allocation8 + $0xb0] sm:$0xff]  ;;  %v608_v20 = vld [vmem:[#allocation8 + $0xa8] sm:$0xff]  ;;  %v610_v21 = vld [vmem:[#allocation8 + $0xb8] sm:$0xff] }
  0xc8   : > { %701 = vmatprep.subr.mxu0 %v654_v33  ;;  %1476 = vmatprep.subr.mxu1 %v1968_v0  ;;  %v606_v22 = vld [vmem:[#allocation8 + $0x98] sm:$0xff]  ;;  %v605_v23 = vld [vmem:[#allocation8 + $0x90] sm:$0xff]  ;;  %v607_v24 = vld [vmem:[#allocation8 + $0xa0] sm:$0xff] }
  0xc9   : > { %702 = vmatpush1.msra.mxu0 %v653_v34  ;;  %1477 = vmatpush3.msra.mxu1 %v655_v35  ;;  %v603_v25 = vld [vmem:[#allocation8 + $0x80] sm:$0xff]  ;;  %v602_v26 = vld [vmem:[#allocation8 + $0x78] sm:$0xff]  ;;  %v604_v27 = vld [vmem:[#allocation8 + $0x88] sm:$0xff] }
  0xca   : > { %703 = vmatprep.subr.mxu0 %v651_v36  ;;  %1478 = vmatprep.subr.mxu1 %v1968_v0  ;;  %v600_v28 = vld [vmem:[#allocation8 + $0x68] sm:$0xff]  ;;  %v599_v29 = vld [vmem:[#allocation8 + $0x60] sm:$0xff]  ;;  %v601_v30 = vld [vmem:[#allocation8 + $0x70] sm:$0xff] }
  0xcb   : > { %704 = vmatpush1.msra.mxu0 %v650_v37  ;;  %1479 = vmatpush3.msra.mxu1 %v652_v38  ;;  %v597_v31 = vld [vmem:[#allocation8 + $0x50] sm:$0xff]  ;;  %v596_v32 = vld [vmem:[#allocation8 + $0x48] sm:$0xff]  ;;  %v598_v33 = vld [vmem:[#allocation8 + $0x58] sm:$0xff] }
  0xcc   : > { %705 = vmatprep.subr.mxu0 %v648_v39  ;;  %1480 = vmatprep.subr.mxu1 %v1968_v0  ;;  %v594_v34 = vld [vmem:[#allocation8 + $0x38] sm:$0xff]  ;;  %v593_v35 = vld [vmem:[#allocation8 + $0x30] sm:$0xff]  ;;  %v595_v36 = vld [vmem:[#allocation8 + $0x40] sm:$0xff] }
  0xcd   : > { %706 = vmatpush1.msra.mxu0 %v647_v40  ;;  %1481 = vmatpush3.msra.mxu1 %v649_v41  ;;  %v591_v37 = vld [vmem:[#allocation8 + $0x20] sm:$0xff]  ;;  %v590_v38 = vld [vmem:[#allocation8 + $0x18] sm:$0xff]  ;;  %v592_v39 = vld [vmem:[#allocation8 + $0x28] sm:$0xff] }
  0xce   : > { %707 = vmatprep.subr.mxu0 %v645_v42  ;;  %1482 = vmatprep.subr.mxu1 %v1968_v0  ;;  %v588_v40 = vld [vmem:[#allocation8 + $0x8] sm:$0xff]  ;;  %v587_v41 = vld [vmem:[#allocation8] sm:$0xff]  ;;  %v589_v42 = vld [vmem:[#allocation8 + $0x10] sm:$0xff] }
  0xcf   : > { %708 = vmatpush1.msra.mxu0 %v644_v43  ;;  %1483 = vmatpush3.msra.mxu1 %v646_v44  ;;  %v1016_v43 = vld [vmem:[#allocation11 + $0xf8] sm:$0xff]  ;;  %v1015_v44 = vld [vmem:[#allocation11 + $0xf0] sm:$0xff] }
  0xd0   : > { %709 = vmatprep.subr.mxu0 %v642_v45  ;;  %1484 = vmatprep.subr.mxu1 %v1968_v0  ;;  %v1014_v45 = vld [vmem:[#allocation11 + $0xe8] sm:$0xff] }
  0xd1   : > { %710 = vmatpush1.msra.mxu0 %v641_v46  ;;  %1485 = vmatpush3.msra.mxu1 %v643_v47  ;;  %v1013_v46 = vld [vmem:[#allocation11 + $0xe0] sm:$0xff]  ;;  %v1012_v47 = vld [vmem:[#allocation11 + $0xd8] sm:$0xff] }
  0xd2   : > { %711 = vmatprep.subr.mxu0 %v639_v48  ;;  %1486 = vmatprep.subr.mxu1 %v1968_v0  ;;  %v1011_v48 = vld [vmem:[#allocation11 + $0xd0] sm:$0xff] }
  0xd3   : > { %712 = vmatpush1.msra.mxu0 %v638_v49  ;;  %1487 = vmatpush3.msra.mxu1 %v640_v50  ;;  %v1010_v49 = vld [vmem:[#allocation11 + $0xc8] sm:$0xff]  ;;  %v1009_v50 = vld [vmem:[#allocation11 + $0xc0] sm:$0xff] }
  0xd4   : > { %713 = vmatprep.subr.mxu0 %v636_v51  ;;  %1488 = vmatprep.subr.mxu1 %v1968_v0  ;;  %v1008_v51 = vld [vmem:[#allocation11 + $0xb8] sm:$0xff] }
  0xd5   : > { %714 = vmatpush1.msra.mxu0 %v635_v52  ;;  %1489 = vmatpush3.msra.mxu1 %v637_v53  ;;  %v1007_v52 = vld [vmem:[#allocation11 + $0xb0] sm:$0xff]  ;;  %v1006_v53 = vld [vmem:[#allocation11 + $0xa8] sm:$0xff] }
  0xd6   : > { %747 = vmatprep.mubr.f32.mxu0 %v1968_v0  ;;  %1490 = vmatprep.mubr.msk.f32.mxu1 %vm1969_vm0, %v1968_v0 }
  0xd7   : > { %1493 = vmatprep.subr.mxu1 %v1968_v0  ;;  %824 = vmatprep.subr.mxu0 %v633_v54  ;;  %v1005_v54 = vld [vmem:[#allocation11 + $0xa0] sm:$0xff] }
 0x175   : > { %v580_v57 = vpop.f32.mrf.mxu1  ;;  %v2289_v59 = vpop.f32.mrf.mxu0 }
 0x176   : > { %748 = vmatmul.mubr.f32.vlgmr.msra.gmra.mxu0 %v580_v57  ;;  %1491 = vmatmul.mubr.f32.vlgmr.msra.gmra.mxu1 %v580_v57  ;;  %v1002_v57 = vld [vmem:[#allocation11 + $0x88] sm:$0xff] }
 0x177   : > { %825 = vmatpush1.msra.mxu0 %v632_v55  ;;  %1494 = vmatpush3.msra.mxu1 %v634_v56  ;;  %v1457_v62 = vpop.f32.mrf.mxu1  ;;  %v1448_v1 = vpop.f32.mrf.mxu0  ;;  %v1004_v55 = vld [vmem:[#allocation11 + $0x98] sm:$0xff]  ;;  %v1003_v56 = vld [vmem:[#allocation11 + $0x90] sm:$0xff] }
 0x178   : > { %826 = vmatprep.subr.mxu0 %v630_v58  ;;  %1495 = vmatprep.subr.mxu1 %v1968_v0  ;;  %v1001_v58 = vld [vmem:[#allocation11 + $0x80] sm:$0xff]  ;;  %v995_v1 = vld [vmem:[#allocation11 + $0x50] sm:$0xff] }
 0x179   : > { %827 = vmatpush1.msra.mxu0 %v629_v60  ;;  %1496 = vmatpush3.msra.mxu1 %v631_v61  ;;  %v999_v60 = vld [vmem:[#allocation11 + $0x70] sm:$0xff]  ;;  %v998_v61 = vld [vmem:[#allocation11 + $0x68] sm:$0xff]  ;;  %v997_v62 = vld [vmem:[#allocation11 + $0x60] sm:$0xff] }
 0x17a   : > { %828 = vmatprep.subr.mxu0 %v627_v63  ;;  %1497 = vmatprep.subr.mxu1 %v1968_v0  ;;  %v996_v63 = vld [vmem:[#allocation11 + $0x58] sm:$0xff] }
 0x17b   : > { %829 = vmatpush1.msra.mxu0 %v626_v2  ;;  %1498 = vmatpush3.msra.mxu1 %v628_v3  ;;  %v994_v2 = vld [vmem:[#allocation11 + $0x48] sm:$0xff]  ;;  %v993_v3 = vld [vmem:[#allocation11 + $0x40] sm:$0xff] }
 0x17c   : > { %830 = vmatprep.subr.mxu0 %v624_v4  ;;  %1499 = vmatprep.subr.mxu1 %v1968_v0  ;;  %v992_v4 = vld [vmem:[#allocation11 + $0x38] sm:$0xff] }
 0x17d   : > { %831 = vmatpush1.msra.mxu0 %v623_v5  ;;  %1500 = vmatpush3.msra.mxu1 %v625_v6  ;;  %v991_v5 = vld [vmem:[#allocation11 + $0x30] sm:$0xff]  ;;  %v990_v6 = vld [vmem:[#allocation11 + $0x28] sm:$0xff] }
 0x17e   : > { %832 = vmatprep.subr.mxu0 %v621_v7  ;;  %1501 = vmatprep.subr.mxu1 %v1968_v0  ;;  %v989_v7 = vld [vmem:[#allocation11 + $0x20] sm:$0xff] }
 0x17f   : > { %833 = vmatpush1.msra.mxu0 %v620_v8  ;;  %1502 = vmatpush3.msra.mxu1 %v622_v9  ;;  %v988_v8 = vld [vmem:[#allocation11 + $0x18] sm:$0xff]  ;;  %v987_v9 = vld [vmem:[#allocation11 + $0x10] sm:$0xff] }
 0x180   : > { %834 = vmatprep.subr.mxu0 %v618_v10  ;;  %1503 = vmatprep.subr.mxu1 %v1968_v0  ;;  %v986_v10 = vld [vmem:[#allocation11 + $0x8] sm:$0xff] }
 0x181   : > { %835 = vmatpush1.msra.mxu0 %v617_v11  ;;  %1504 = vmatpush3.msra.mxu1 %v619_v12  ;;  %v985_v11 = vld [vmem:[#allocation11] sm:$0xff]  ;;  %v585_v12 = vld [vmem:[%s584_s25] sm:$0xff] }
 0x182   : > { %836 = vmatprep.subr.mxu0 %v615_v13  ;;  %1505 = vmatprep.subr.mxu1 %v1968_v0  ;;  %v967_v13 = vlaneseq }
 0x183   : > { %837 = vmatpush1.msra.mxu0 %v614_v14  ;;  %1506 = vmatpush3.msra.mxu1 %v616_v15 }
 0x184   : > { %838 = vmatprep.subr.mxu0 %v612_v16  ;;  %1507 = vmatprep.subr.mxu1 %v1968_v0  ;;  %v2316_v14 = vshrl.u32 %v967_v13, 7  ;;  %v2322_v16 = vld [vmem:[%s2388_s7] sm:$0x7] }
 0x185   : > { %839 = vmatpush1.msra.mxu0 %v611_v17  ;;  %1508 = vmatpush3.msra.mxu1 %v613_v18 }
 0x186   : > { %840 = vmatprep.subr.mxu0 %v609_v19  ;;  %1509 = vmatprep.subr.mxu1 %v1968_v0  ;;  %v977_v15 = vsub.s32 2, %v2316_v14  ;;  %v973_v17 = vsub.s32 1, %v2316_v14 }
 0x187   : > { %841 = vmatpush1.msra.mxu0 %v608_v20  ;;  %1510 = vmatpush3.msra.mxu1 %v610_v21  ;;  %v1118_v20 = vld [vmem:[#allocation12 + $0x78] sm:$0xff]  ;;  %v1117_v21 = vld [vmem:[#allocation12 + $0x70] sm:$0xff] }
 0x188   : > { %842 = vmatprep.subr.mxu0 %v606_v22  ;;  %1511 = vmatprep.subr.mxu1 %v1968_v0  ;;  %v978_v18 = vrot.slane %v2322_v16, %v977_v15  ;;  %v974_v19 = vrot.slane %v2322_v16, %v973_v17  ;;  %v1116_v22 = vld [vmem:[#allocation12 + $0x68] sm:$0xff] }
 0x189   : > { %843 = vmatpush1.msra.mxu0 %v605_v23  ;;  %1512 = vmatpush3.msra.mxu1 %v607_v24  ;;  %v1115_v23 = vld [vmem:[#allocation12 + $0x60] sm:$0xff]  ;;  %v1114_v24 = vld [vmem:[#allocation12 + $0x58] sm:$0xff] }
 0x18a   : > { %844 = vmatprep.subr.mxu0 %v603_v25  ;;  %1513 = vmatprep.subr.mxu1 %v1968_v0  ;;  %v1113_v25 = vld [vmem:[#allocation12 + $0x50] sm:$0xff] }
 0x18b   : > { %845 = vmatpush1.msra.mxu0 %v602_v26  ;;  %1514 = vmatpush3.msra.mxu1 %v604_v27  ;;  %v1112_v26 = vld [vmem:[#allocation12 + $0x48] sm:$0xff]  ;;  %v1111_v27 = vld [vmem:[#allocation12 + $0x40] sm:$0xff] }
 0x18c   : > { %846 = vmatprep.subr.mxu0 %v600_v28  ;;  %1515 = vmatprep.subr.mxu1 %v1968_v0  ;;  %v1110_v28 = vld [vmem:[#allocation12 + $0x38] sm:$0xff] }
 0x18d   : > { %847 = vmatpush1.msra.mxu0 %v599_v29  ;;  %1516 = vmatpush3.msra.mxu1 %v601_v30  ;;  %v1109_v29 = vld [vmem:[#allocation12 + $0x30] sm:$0xff]  ;;  %v1108_v30 = vld [vmem:[#allocation12 + $0x28] sm:$0xff] }
 0x18e   : > { %848 = vmatprep.subr.mxu0 %v597_v31  ;;  %1517 = vmatprep.subr.mxu1 %v1968_v0  ;;  %v1107_v31 = vld [vmem:[#allocation12 + $0x20] sm:$0xff] }
 0x18f   : > { %849 = vmatpush1.msra.mxu0 %v596_v32  ;;  %1518 = vmatpush3.msra.mxu1 %v598_v33  ;;  %v1106_v32 = vld [vmem:[#allocation12 + $0x18] sm:$0xff]  ;;  %v1105_v33 = vld [vmem:[#allocation12 + $0x10] sm:$0xff] }
 0x190   : > { %850 = vmatprep.subr.mxu0 %v594_v34  ;;  %1519 = vmatprep.subr.mxu1 %v1968_v0  ;;  %v1104_v34 = vld [vmem:[#allocation12 + $0x8] sm:$0xff] }
 0x191   : > { %851 = vmatpush1.msra.mxu0 %v593_v35  ;;  %1520 = vmatpush3.msra.mxu1 %v595_v36  ;;  %v1103_v35 = vld [vmem:[#allocation12] sm:$0xff] }
 0x192   : > { %852 = vmatprep.subr.mxu0 %v591_v37  ;;  %1521 = vmatprep.subr.mxu1 %v1968_v0 }
 0x193   : > { %853 = vmatpush1.msra.mxu0 %v590_v38  ;;  %1522 = vmatpush3.msra.mxu1 %v592_v39 }
 0x194   : > { %854 = vmatprep.subr.mxu0 %v588_v40  ;;  %1523 = vmatprep.subr.mxu1 %v1968_v0 }
 0x195   : > { %855 = vmatpush1.msra.mxu0 %v587_v41  ;;  %888 = vmatprep.mubr.f32.mxu0 %v1968_v0 }
 0x196   : > { %1524 = vmatpush3.msra.mxu1 %v589_v42  ;;  %1525 = vmatprep.mubr.msk.f32.mxu1 %vm1969_vm0, %v1968_v0 }
 0x197   : > { %889 = vmatmul.mubr.f32.vlgmr.msra.gmra.mxu0 %v2289_v59  ;;  %1526 = vmatmul.mubr.f32.vlgmr.msra.gmra.mxu1 %v2289_v59  ;;  %v1000_v59 = vld [vmem:[#allocation11 + $0x78] sm:$0xff] }
 0x198   : > { %1017 = vmatprep.subr.mxu0 %v1016_v43  ;;  %1081 = vmatprep.mubr.f32.mxu0 %v1968_v0 }
 0x199   : > { %1018 = vmatpush1.msra.mxu0 %v1015_v44  ;;  %1528 = vmatprep.subr.mxu1 %v1968_v0 }
 0x19a   : > { %1019 = vmatprep.subr.mxu0 %v1014_v45  ;;  %1560 = vmatprep.mubr.msk.f32.mxu1 %vm1969_vm0, %v1968_v0 }
 0x19b   : > { %1020 = vmatpush1.msra.mxu0 %v1013_v46  ;;  %1529 = vmatpush3.msra.mxu1 %v1118_v20 }
 0x19c   : > { %1021 = vmatprep.subr.mxu0 %v1012_v47  ;;  %1530 = vmatprep.subr.mxu1 %v1968_v0 }
 0x19d   : > { %1022 = vmatpush1.msra.mxu0 %v1011_v48  ;;  %1531 = vmatpush3.msra.mxu1 %v1117_v21  ;;  %v969_v48 = vsub.s32 0, %v2316_v14 }
 0x19e   : > { %1023 = vmatprep.subr.mxu0 %v1010_v49  ;;  %1532 = vmatprep.subr.mxu1 %v1968_v0 }
 0x19f   : > { %1024 = vmatpush1.msra.mxu0 %v1009_v50  ;;  %1533 = vmatpush3.msra.mxu1 %v1116_v22  ;;  %v970_v50 = vrot.slane %v2322_v16, %v969_v48 }
 0x1a0   : > { %1025 = vmatprep.subr.mxu0 %v1008_v51  ;;  %1534 = vmatprep.subr.mxu1 %v1968_v0 }
 0x1a1   : > { %1026 = vmatpush1.msra.mxu0 %v1007_v52  ;;  %1535 = vmatpush3.msra.mxu1 %v1115_v23 }
 0x1a2   : > { %1027 = vmatprep.subr.mxu0 %v1006_v53  ;;  %1536 = vmatprep.subr.mxu1 %v1968_v0 }
 0x1a3   : > { %1028 = vmatpush1.msra.mxu0 %v1005_v54  ;;  %1537 = vmatpush3.msra.mxu1 %v1114_v24 }
 0x1a4   : > { %1029 = vmatprep.subr.mxu0 %v1004_v55  ;;  %1538 = vmatprep.subr.mxu1 %v1968_v0 }
 0x1a5   : > { %1030 = vmatpush1.msra.mxu0 %v1003_v56  ;;  %1539 = vmatpush3.msra.mxu1 %v1113_v25 }
 0x1a6   : > { %1031 = vmatprep.subr.mxu0 %v1002_v57  ;;  %1540 = vmatprep.subr.mxu1 %v1968_v0 }
 0x1a7   : > { %1032 = vmatpush1.msra.mxu0 %v1001_v58  ;;  %1541 = vmatpush3.msra.mxu1 %v1112_v26 }
 0x1a8   : > { %1033 = vmatprep.subr.mxu0 %v1000_v59  ;;  %1542 = vmatprep.subr.mxu1 %v1968_v0 }
 0x1a9   : > { %1034 = vmatpush1.msra.mxu0 %v999_v60  ;;  %1543 = vmatpush3.msra.mxu1 %v1111_v27 }
 0x1aa   : > { %1035 = vmatprep.subr.mxu0 %v998_v61  ;;  %1544 = vmatprep.subr.mxu1 %v1968_v0  ;;  %v586_v61 = vld [vmem:[%s2239_s13] sm:$0xff] }
 0x1ab   : > { %1036 = vmatpush1.msra.mxu0 %v997_v62  ;;  %1545 = vmatpush3.msra.mxu1 %v1110_v28 }
 0x1ac   : > { %1037 = vmatprep.subr.mxu0 %v996_v63  ;;  %1546 = vmatprep.subr.mxu1 %v1968_v0 }
 0x1ad   : > { %1038 = vmatpush1.msra.mxu0 %v995_v1  ;;  %1547 = vmatpush3.msra.mxu1 %v1109_v29 }
 0x1ae   : > { %1039 = vmatprep.subr.mxu0 %v994_v2  ;;  %1548 = vmatprep.subr.mxu1 %v1968_v0 }
 0x1af   : > { %1040 = vmatpush1.msra.mxu0 %v993_v3  ;;  %1549 = vmatpush3.msra.mxu1 %v1108_v30 }
 0x1b0   : > { %1041 = vmatprep.subr.mxu0 %v992_v4  ;;  %1550 = vmatprep.subr.mxu1 %v1968_v0 }
 0x1b1   : > { %1042 = vmatpush1.msra.mxu0 %v991_v5  ;;  %1551 = vmatpush3.msra.mxu1 %v1107_v31 }
 0x1b2   : > { %1043 = vmatprep.subr.mxu0 %v990_v6  ;;  %1552 = vmatprep.subr.mxu1 %v1968_v0 }
 0x1b3   : > { %1044 = vmatpush1.msra.mxu0 %v989_v7  ;;  %1553 = vmatpush3.msra.mxu1 %v1106_v32 }
 0x1b4   : > { %1045 = vmatprep.subr.mxu0 %v988_v8  ;;  %1554 = vmatprep.subr.mxu1 %v1968_v0 }
 0x1b5   : > { %1046 = vmatpush1.msra.mxu0 %v987_v9  ;;  %1555 = vmatpush3.msra.mxu1 %v1105_v33 }
 0x1b6   : > { %1047 = vmatprep.subr.mxu0 %v986_v10  ;;  %1556 = vmatprep.subr.mxu1 %v1968_v0 }
 0x1b7   : > { %1048 = vmatpush1.msra.mxu0 %v985_v11  ;;  %1557 = vmatpush3.msra.mxu1 %v1104_v34 }
 0x1b8   : > { %1082 = vmatmul.mubr.f32.vlgmr.msra.gmra.mxu0 %v585_v12  ;;  %1558 = vmatprep.subr.mxu1 %v1968_v0 }
 0x1b9   : > { %1559 = vmatpush3.msra.mxu1 %v1103_v35 }
 0x236   : > { %v820_v36 = vpop.f32.mrf.mxu1  ;;  %v749_v38 = vpop.f32.mrf.mxu0 }
 0x238   : > { %v1492_v37 = vpop.f32.mrf.mxu1  ;;  %v751_v39 = vpop.f32.mrf.mxu0 }
 0x257   : > { %v890_v40 = vpop.f32.mrf.mxu0  ;;  %v961_v41 = vpop.f32.mrf.mxu1 }
 0x258   : > { %v962_v42 = vadd.f32 %v961_v41, %v820_v36  ;;  %v891_v49 = vadd.f32 %v890_v40, %v749_v38 }
 0x259   : > { %v892_v43 = vpop.f32.mrf.mxu0  ;;  %v1527_v44 = vpop.f32.mrf.mxu1 }
 0x25a   : > { %v893_v45 = vadd.f32 %v892_v43, %v751_v39  ;;  %v984_v46 = vadd.f32 %v978_v18, %v962_v42  ;;  %v982_v0 = vadd.f32 %v970_v50, %v891_v49 }
 0x25c   : > { %v983_v47 = vadd.f32 %v974_v19, %v893_v45 }
 0x278   : > { %v1083_v51 = vpop.f32.mrf.mxu0 }
 0x279   : > { %v1088_v52 = vadd.f32 %v1083_v51, %v982_v0 }
 0x27a   : > { %v1085_v53 = vpop.f32.mrf.mxu0 }
 0x27b   : > { %v1375_v54 = vmul.f32 -1.442695, %v1088_v52  ;;  %v1089_v55 = vadd.f32 %v1085_v53, %v983_v47 }
 0x27d   : > { %1673 = vpow2.f32 %v1375_v54  ;;  %v1376_v56 = vmul.f32 -1.442695, %v1089_v55 }
 0x27f   : > { %1675 = vpow2.f32 %v1376_v56 }
 0x28a   : > { %v1674_v57 = vpop.eup %1673 }
 0x28b   : > { %v1096_v58 = vadd.f32 1.0, %v1674_v57 }
 0x28c   : > { %v1676_v59 = vpop.eup %1675 }
 0x28d   : > { %1677 = vrcp.f32 %v1096_v58  ;;  %v1097_v60 = vadd.f32 1.0, %v1676_v59 }
 0x28f   : > { %1679 = vrcp.f32 %v1097_v60 }
 0x29a   : > { %v1678_v62 = vpop.eup %1677 }
 0x29b   : > { %v1102_v63 = vmul.f32 %v1678_v62, %v586_v61 }
 0x29c   : > { %v1680_v1 = vpop.eup %1679 }
 0x29d   : > { %1561 = vmatmul.mubr.f32.vlgmr.msra.gmra.mxu1 %v1102_v63  ;;  %v1191_v2 = vsub.f32 1.0, %v1680_v1 }
 0x29f   : > { %v1192_v3 = vmul.f32 %v1191_v2, %v586_v61 }
 0x35d   : > { %v1185_v4 = vpop.f32.mrf.mxu1 }
 0x35e   : > { %v1189_v5 = vadd.f32 %v1185_v4, %v984_v46 }
 0x35f   : > { %v1562_v6 = vpop.f32.mrf.mxu1 }
 0x360   : > { %1681 = vtanh.f32 %v1189_v5 }
 0x36d   : > { %v1682_v7 = vpop.eup %1681 }
 0x36e   : > { %v1193_v8 = vmul.f32 %v1682_v7, %v1680_v1 }
 0x370   : > { %v1194_v9 = vadd.f32 %v1193_v8, %v1192_v3 }
 0x372   : > { %1195 = vst [vmem:[%s429_s8] sm:$0xff] %v1194_v9 }
 0x373   : > { %1882 = shalt.err (!%p1879_p4)
}
 0x374   : > { %s1883_s22 = scalar_lea.hbm %s1208_s21, 128  ;;  %s1887_s23 = scalar_lea.hbm %s2447_s4, 384 }
 0x375   : > { %p1884_p8 = scmp.ne.s32.totalorder %s1208_s21, %s1883_s22  ;;  %p1888_p3 = scmp.lt.s32.totalorder %s1208_s21, %s2447_s4 }
 0x376   : > { %p1889_p9 = scmp.lt.s32.totalorder %s1887_s23, %s1883_s22 }
 0x377   : > { %p1885_p10 = pnand %p1884_p8, %p2448_p1 }
 0x378   : > { %p1890_p13 = por %p1889_p9, %p1888_p3 }
 0x379   : > { %p1886_p7 = pneg %p1885_p10 }
 0x37b   : > { %p1891_p5 = pnand %p1890_p13, %p1886_p7 }
 0x37d   : > { %1894 = shalt.err (!%p1891_p5)
}
 0x37e   : > { %1587 = dma.vmem_to_hbm [thread:$0]  (%p2448_p1), %s1211_s16, 128, %s1208_s21, %s1197_s0  }
 0x37f PF: > { %s2449_s13 = sld [smem:[#allocation22_spill]]  ;;  %p1627_p11 = scmp.ge.s32.totalorder %s1953_s30, 2 }
 0x380   : > { %s2450_s11 = sld [smem:[#allocation23_spill]] }
 0x385   : > { %s1222_s25 = sand.u32 1, %s2449_s13  }
 0x386   : > { %p2451_p6 = scmp.ne.s32.totalorder %s2450_s11, 0  ;;  %s1223_s20 = scalar_lea.sflag [#allocation4], %s1222_s25 }
 0x388   : > { %p1613_p0 = pnand %p1627_p11, %p2451_p6 }
 0x38a   : > { %p1614_p12 = pneg %p1613_p0 }
 0x38c   : > { %1936 = dma.done.wait (%p1614_p12), %s1223_s20, 128  }
 0x38d   : > { %1938 = vsyncadd (%p1614_p12), %s1223_s20, 4294967168  ;;  %s2452_s30 = sld [smem:[#allocation24_spill]]  ;;  %s2454_s27 = smov %s1945_s28 }
 0x38e   : > { %s2453_s3 = sld [smem:[#allocation25_spill]]  ;;  %s2455_s28 = smov %s1949_s29 }
 0x393   : > { %p24_p2 = scmp.ge.s32.totalorder %s2452_s30, 5  }
 0x394   : > { %s2456_s29 = smov %s2453_s3 }
 0x395   :  { %26 = sbr.rel (!%p24_p2) target bundleno = 14 (0xe), region = 130 }
 0x39a   :  { %1228 = vsyncpa [#allocation3], 1 }
 0x39b   :  { %1230 = vsyncpa [#allocation3 + $0x1], 1 }
 0x39c   :  { %1231 = vsyncpa [#allocation6], 1 }
 0x39d   :  { %1232 = vsyncpa [#allocation10], 1 }
 0x39e   :  { %1233 = vsyncpa [#allocation13], 1 }
 0x39f   :  { %1234 = vsyncpa [#allocation4], 1 }
 0x3a0   :  { %1236 = vsyncpa [#allocation4 + $0x1], 1 }

</bundles_post_ra>
